<compile_context>
chip_gen: v7x
topology: tpu7x:2x2x1
jax: 0.10.0
libtpu: 0.0.40
codegen_flags: <defaults>
</compile_context>

<pallas_src>
import functools

import numpy as np
import jax
import jax.numpy as jnp
from jax.experimental import pallas as pl
from jax.experimental.pallas import tpu as pltpu


def _round_up(v, m):
    return (v + m - 1) // m * m


def _pick_tile(extent, target, align):
    """Largest divisor of `extent` that is a multiple of `align` and <= target.

    `extent` must itself be a multiple of `align` (so `align` always works)."""
    target = max(target, align)
    if extent <= target:
        return extent
    cand = target - target % align
    while cand > align:
        if extent % cand == 0:
            return cand
        cand -= align
    return align


@functools.lru_cache(maxsize=16)
def _dft_basis(L, dtype_name):
    """Padded real-DFT basis: rows [0:K) = cos, rows [K_pad:K_pad+K) = -sin.

    Built once per (L, dtype) on host with exact integer (k*n) mod L and float64
    trig, then cast to the MXU compute dtype."""
    K = L // 2 + 1
    K_pad = _round_up(K, 8)
    L_pad = _round_up(L, 128)
    n = np.arange(L, dtype=np.int64)
    k = np.arange(K, dtype=np.int64)
    idx = (k[:, None] * n[None, :]) % L                      # exact, no f32 rounding
    ang = (2.0 * np.pi / float(L)) * idx.astype(np.float64)  # (K, L)
    basis = np.zeros((2 * K_pad, L_pad), dtype=np.float64)
    basis[:K, :L] = np.cos(ang)
    basis[K_pad:K_pad + K, :L] = -np.sin(ang)                # -sin folded in here
    return jnp.asarray(basis, dtype=jnp.dtype(dtype_name))


def _fft_matmul_kernel(basis_ref, x_ref, o_ref):
    # basis_ref: (TM, TL)  constant DFT basis tile (rows = [cos | -sin], padded)
    # x_ref:     (TL, TN)  time-domain data, batch folded into the lane dim
    # o_ref:     (TM, TN)  f32 output tile; acts as the accumulator across the
    #                      L (reduction) grid axis -> no scratch, no zero-fill.
    l = pl.program_id(2)
    prod = jnp.dot(basis_ref[...], x_ref[...], preferred_element_type=jnp.float32)

    @pl.when(l == 0)
    def _():
        o_ref[...] = prod

    @pl.when(l != 0)
    def _():
        o_ref[...] += prod


def fft_transformer(x, *, tm=512, tn=512, tl=2048, compute_dtype=jnp.bfloat16):
    """Pallas TPU equivalent of:
        x_fft = torch.fft.rfft(x, dim=1)
        return torch.cat([x_fft.real, x_fft.imag], dim=-1)
    """
    B, L, D = x.shape
    K = L // 2 + 1
    K_pad = _round_up(K, 8)
    L_pad = _round_up(L, 128)
    N = B * D
    N_pad = _round_up(N, 128)
    M_pad = 2 * K_pad

    itemsize = jnp.dtype(compute_dtype).itemsize

    # Cached, padded DFT basis in the MXU compute dtype.
    basis_p = _dft_basis(L, jnp.dtype(compute_dtype).name)

    # Fold batch into the MXU N (lane) dimension: (B, L, D) -> (L, B*D), cast + pad.
    x2 = jnp.transpose(x, (1, 0, 2)).reshape(L, N).astype(compute_dtype)
    x_p = jnp.pad(x2, ((0, L_pad - L), (0, N_pad - N)))

    # Tiles are divisors of the (minimally) padded extents -> zero wasted FLOPs.
    TM = _pick_tile(M_pad, tm, 8)
    TN = _pick_tile(N_pad, tn, 128)
    TL = _pick_tile(L_pad, tl, 128)

    # v7x has 2 TensorCores: ensure at least one "parallel" axis has >= 2 blocks.
    if M_pad // TM == 1 and N_pad // TN == 1:
        if TN % 256 == 0:
            TN //= 2
        elif TM % 16 == 0:
            TM //= 2

    grid = (M_pad // TM, N_pad // TN, L_pad // TL)

    # Explicit VMEM budget: double-buffered inputs + output block, with headroom,
    # capped so the same config is safe on v7x (64 MiB/TC physical VMEM).
    vmem_est = 2 * (TM * TL + TL * TN) * itemsize + 2 * TM * TN * 4
    vmem_limit = int(min(max(32 << 20, 2 * vmem_est), 48 << 20))

    cost = pl.CostEstimate(
        flops=2 * M_pad * N_pad * L_pad,
        transcendentals=0,
        bytes_accessed=(M_pad * L_pad + L_pad * N_pad) * itemsize + M_pad * N_pad * 4,
    )

    y = pl.pallas_call(
        _fft_matmul_kernel,
        out_shape=jax.ShapeDtypeStruct((M_pad, N_pad), jnp.float32),
        grid_spec=pltpu.PrefetchScalarGridSpec(
            num_scalar_prefetch=0,
            grid=grid,
            in_specs=[
                pl.BlockSpec((TM, TL), lambda i, j, l: (i, l)),
                pl.BlockSpec((TL, TN), lambda i, j, l: (l, j)),
            ],
            out_specs=pl.BlockSpec((TM, TN), lambda i, j, l: (i, j)),
        ),
        compiler_params=pltpu.CompilerParams(
            dimension_semantics=("parallel", "parallel", "arbitrary"),
            vmem_limit_bytes=vmem_limit,
        ),
        cost_estimate=cost,
    )(basis_p, x_p)

    # Plain-JAX glue: unpack (M_pad, N_pad) -> (B, K, 2*D).
    real = y[:K, :N].reshape(K, B, D).transpose(1, 0, 2)               # (B, K, D)
    imag = y[K_pad:K_pad + K, :N].reshape(K, B, D).transpose(1, 0, 2)  # (B, K, D)
    return jnp.concatenate([real, imag], axis=-1)


if __name__ == "__main__":
    key0, key1 = jax.random.split(jax.random.PRNGKey(0))

    def ref_fn(xx):
        xf = jnp.fft.rfft(xx, axis=1)
        return jnp.concatenate([xf.real, xf.imag], axis=-1).astype(jnp.float32)

    # 1) Small shape, f32 MXU path — tight tolerance.
    B, L, D = 2, 16, 8
    x = jax.random.normal(key0, (B, L, D), dtype=jnp.float32)
    out = jax.block_until_ready(fft_transformer(x, compute_dtype=jnp.float32))
    ref = ref_fn(x)
    assert out.shape == (B, L // 2 + 1, 2 * D), out.shape
    assert jnp.allclose(out, ref, atol=2e-3, rtol=2e-3), float(jnp.max(jnp.abs(out - ref)))

    # 2) Same data, default bf16 MXU path — tolerance ~ sqrt(L) * eps_bf16.
    out_bf16 = jax.block_until_ready(fft_transformer(x))
    assert out_bf16.shape == (B, L // 2 + 1, 2 * D), out_bf16.shape
    assert jnp.allclose(out_bf16, ref, atol=1e-1, rtol=1e-1), float(
        jnp.max(jnp.abs(out_bf16 - ref)))

    # 3) Multi-tile path: reduction across L tiles, M_pad > TM, K_pad != K.
    B2, L2, D2 = 2, 256, 8
    x2 = jax.random.normal(key1, (B2, L2, D2), dtype=jnp.float32)
    out2 = jax.block_until_ready(
        fft_transformer(x2, tm=16, tn=128, tl=128, compute_dtype=jnp.float32))
    ref2 = ref_fn(x2)
    assert out2.shape == (B2, L2 // 2 + 1, 2 * D2), out2.shape
    assert jnp.allclose(out2, ref2, atol=5e-3, rtol=5e-3), float(
        jnp.max(jnp.abs(out2 - ref2)))

    print("KERNEL_OK")
</pallas_src>

<mosaic_0001>
module attributes {stable_mosaic.version = 11 : i64} {
  func.func @_fft_matmul_kernel(%arg0: i32, %arg1: i32, %arg2: i32, %arg3: memref<16x128xf32, #tpu.memory_space<vmem>>, %arg4: memref<128x128xf32, #tpu.memory_space<vmem>>, %arg5: memref<16x128xf32, #tpu.memory_space<vmem>>) attributes {dimension_semantics = [#tpu.dimension_semantics<parallel>, #tpu.dimension_semantics<parallel>, #tpu.dimension_semantics<arbitrary>], iteration_bounds = array<i64: 2, 1, 1>, scalar_prefetch = 0 : i64, scratch_operands = 0 : i64, tpu.core_type = #tpu.core_type<tc>, window_params = [{transform_indices = @transform_0, window_bounds = array<i64: 16, 128>}, {transform_indices = @transform_1, window_bounds = array<i64: 128, 128>}, {transform_indices = @transform_2, window_bounds = array<i64: 16, 128>}]} {
    %c0 = arith.constant 0 : index
    %c0_0 = arith.constant 0 : index
    %0 = vector.load %arg3[%c0, %c0_0] : memref<16x128xf32, #tpu.memory_space<vmem>>, vector<16x128xf32>
    %c0_1 = arith.constant 0 : index
    %c0_2 = arith.constant 0 : index
    %1 = vector.load %arg4[%c0_1, %c0_2] : memref<128x128xf32, #tpu.memory_space<vmem>>, vector<128x128xf32>
    %cst = arith.constant dense<0.000000e+00> : vector<16x128xf32>
    %2 = tpu.matmul %0, %1, %cst {dimension_numbers = #tpu.dot_dimension_numbers<[1], [0], [0], [1], [0, 0, 1, 1], [], []>} : vector<16x128xf32>, vector<128x128xf32>, vector<16x128xf32> -> vector<16x128xf32>
    %c0_i32 = arith.constant 0 : i32
    %3 = arith.cmpi eq, %arg2, %c0_i32 : i32
    %4 = arith.extui %3 : i1 to i32
    %c0_i32_3 = arith.constant 0 : i32
    %5 = arith.cmpi ne, %4, %c0_i32_3 : i32
    scf.if %5 {
      %c0_6 = arith.constant 0 : index
      %c0_7 = arith.constant 0 : index
      %9 = vector.load %arg5[%c0_6, %c0_7] : memref<16x128xf32, #tpu.memory_space<vmem>>, vector<16x128xf32>
      tpu.vector_store %arg5[%c0_6, %c0_7], %2 {strides = array<i32>} : memref<16x128xf32, #tpu.memory_space<vmem>>, vector<16x128xf32>,
    } else {
    }
    %c0_i32_4 = arith.constant 0 : i32
    %6 = arith.cmpi ne, %arg2, %c0_i32_4 : i32
    %7 = arith.extui %6 : i1 to i32
    %c0_i32_5 = arith.constant 0 : i32
    %8 = arith.cmpi ne, %7, %c0_i32_5 : i32
    scf.if %8 {
      %c0_6 = arith.constant 0 : index
      %c0_7 = arith.constant 0 : index
      %9 = vector.load %arg5[%c0_6, %c0_7] : memref<16x128xf32, #tpu.memory_space<vmem>>, vector<16x128xf32>
      %10 = arith.addf %9, %2 : vector<16x128xf32>
      %c0_8 = arith.constant 0 : index
      %c0_9 = arith.constant 0 : index
      %11 = vector.load %arg5[%c0_8, %c0_9] : memref<16x128xf32, #tpu.memory_space<vmem>>, vector<16x128xf32>
      tpu.vector_store %arg5[%c0_8, %c0_9], %10 {strides = array<i32>} : memref<16x128xf32, #tpu.memory_space<vmem>>, vector<16x128xf32>,
    } else {
    }
    return
  }
  func.func @transform_0(%arg0: i32, %arg1: i32, %arg2: i32) -> (i32, i32) {
    %c0_i32 = arith.constant 0 : i32
    return %arg0, %arg2 : i32, i32
  }
  func.func @transform_1(%arg0: i32, %arg1: i32, %arg2: i32) -> (i32, i32) {
    %c0_i32 = arith.constant 0 : i32
    return %arg2, %arg1 : i32, i32
  }
  func.func @transform_2(%arg0: i32, %arg1: i32, %arg2: i32) -> (i32, i32) {
    %c0_i32 = arith.constant 0 : i32
    return %arg0, %arg1 : i32, i32
  }
}

</mosaic_0001>

<bundles_post_ra>
// kernel: tpu_custom_call.1
= control target key start
LH: loop header
LB: loop body
LE: loop exit
PB: predicated region body
PF: predicated region fallthrough
CT: control target
= control target key end

     0   :  { %7 = vsyncpa [#allocation3], 0  ;;  %s1023_s0 = inlined_call_operand.hbm [shape: f32[32,128], index: 0, kind: input, shape index: {}]   ;;  %s1024_s1 = inlined_call_operand.hbm [shape: f32[128,128], index: 1, kind: input, shape index: {}]   ;;  %s1025_s2 = inlined_call_operand.hbm [shape: f32[32,128], index: 2, kind: output, shape index: {}]  }
   0x1   :  { %9 = vsyncpa [#allocation3 + $0x1], 0 }
   0x2   :  { %10 = vsyncpa [#allocation6], 0 }
   0x3   :  { %11 = vsyncpa [#allocation4], 0 }
   0x4   :  { %13 = vsyncpa [#allocation4 + $0x1], 0  ;;  %s790_s9 = smov 0   ;;  %s792_s10 = smov 0  }
   0x5   :  { %s794_s11 = smov 0   ;;  %s796_s12 = smov 0  }
   0x6   :  { %s798_s13 = smov 0   ;;  %s800_s14 = smov 0  }
   0x7 LB: > { %s441_s15 = sadd.s32 4294967295, %s766_s14   ;;  %s442_s16 = sadd.s32 4294967294, %s766_s14   ;;  %s766_s14 = sphi %s800_s14, %s19_s14   ;;  %s762_s13 = sphi %s798_s13, %s1049_s13   ;;  %s758_s12 = sphi %s796_s12, %s1048_s12   ;;  %s754_s11 = sphi %s794_s11, %s1047_s11   ;;  %s750_s10 = sphi %s792_s10, %s1046_s10   ;;  %s746_s9 = sphi %s790_s9, %s1045_s9  }
   0x8   : > { %p60_p0 = scmp.ne.s32.totalorder %s750_s10, %s746_s9  ;;  %p824_p1 = scmp.eq.s32.totalorder %s441_s15, 0 }
   0x9   : > { %p828_p2 = scmp.eq.s32.totalorder %s441_s15, 1  ;;  %p120_p3 = scmp.eq.s32.totalorder %s442_s16, 1 }
   0xa   : > { %s1030_s17 = scalar_select %p824_p1, 1, 0 }
   0xb   : > { %s1031_s18 = scalar_select %p828_p2, 1, 0 }
   0xc   : > { %p834_p4 = por %p824_p1, %p60_p0  ;;  %p443_p5 = scmp.ge.s32.totalorder %s766_s14, 1 }
   0xd   : > { %p839_p6 = por %p120_p3, %p60_p0  ;;  %p127_p7 = scmp.lt.s32.totalorder %s766_s14, 3 }
   0xe   : > { %s1032_s19 = scalar_select %p834_p4, 1, 0 }
   0xf   : > { %s1033_s20 = scalar_select %p839_p6, 1, 0 }
  0x10   : > { %p844_p8 = pnand %p443_p5, %p127_p7  ;;  %s768_s22 = smov [#allocation5]  }
  0x11   : > { %s143_s23 = sshll.u32 %s768_s22, 4  ;;  %s38_s25 = sadd.s32 1, %s762_s13  ;;  %s144_s23 = int_to_ptr.vmem [resolvable:$true] %s143_s23 }
  0x12   : > { %s1034_s21 = scalar_select %p844_p8, 1, 0 }
  0x13   : > { %p553_p9 = pneg %p844_p8  ;;  %s622_s28 = scalar_lea.hbm %s1024_s1, 2048 }
  0x14   : > { %p623_p12 = scmp.ne.s32.totalorder %s1024_s1, %s622_s28  ;;  %p629_p5 = scmp.lt.u32.totalorder %s622_s28, %s1024_s1 }
  0x15   : > { %p853_p11 = pnand %p553_p9, %p824_p1 }
  0x17   : > { %p624_p13 = pneg %p853_p11 }
  0x19   : > { %p625_p0 = pnand %p624_p13, %p623_p12 }
  0x1b   : > { %p626_p3 = pneg %p625_p0 }
  0x1d   : > { %p631_p7 = pnand %p629_p5, %p626_p3 }
  0x1f   : > { %634 = shalt.err (!%p631_p7)
}
  0x20   : > { %s635_s5 = scalar_lea.vmem %s144_s23, 2048  ;;  %p643_p1 = scmp.lt.s32.totalorder %s144_s23, %s144_s23 }
  0x21   : > { %p636_p9 = scmp.ne.s32.totalorder %s144_s23, %s635_s5  ;;  %p644_p4 = scmp.lt.s32.totalorder %s635_s5, %s635_s5 }
  0x23   : > { %p638_p10 = pnand %p636_p9, %p624_p13  ;;  %p645_p8 = por %p644_p4, %p643_p1 }
  0x25   : > { %p639_p6 = pneg %p638_p10 }
  0x27   : > { %p646_p2 = pnand %p645_p8, %p639_p6 }
  0x29   : > { %649 = shalt.err (!%p646_p2)
}
  0x2a   : > { %s769_s6 = smov 128   ;;  %s770_s7 = smov 8  }
  0x2b   : > { %556 = dma.hbm_to_vmem [thread:$0]  (!%p853_p11), %s1024_s1, 2048, %s144_s23, [#allocation6], %s769_s6, %s769_s6, %s770_s7  }
  0x2c   : > { %p40_p1 = scmp.ge.s32.totalorder %s38_s25, 2  ;;  %s47_s16 = sadd.s32 1, %s754_s11 }
  0x2d   : > { %p54_p2 = scmp.ne.s32.totalorder %s754_s11, %s750_s10  ;;  %p55_p4 = scmp.eq.s32.totalorder %s766_s14, 0 }
  0x2e   : > { %s1051_s25 = smov (%p40_p1, %s38_s25), 0  ;;  %p1037_p8 = scmp.ne.s32.totalorder %s1031_s18, 0 }
  0x2f   : > { %p883_p6 = por %p55_p4, %p54_p2  ;;  %s42_s26 = ssub.s32 %s762_s13, %s1051_s25 }
  0x30   : > { %p889_p10 = por %p1037_p8, %p54_p2  ;;  %p566_p12 = scmp.lt.s32.totalorder %s766_s14, 2 }
  0x31   : > { %p45_p11 = scmp.eq.s32.totalorder %s42_s26, 0  ;;  %s157_s23 = sand.u32 1, %s754_s11  }
  0x32   : > { %s446_s27 = sshll.u32 %s157_s23, 4  ;;  %s458_s29 = sshll.u32 %s762_s13, 8 }
  0x33   : > { %s898_s28 = scalar_select %p45_p11, %s754_s11, %s47_s16  }
  0x34   : > { %s904_s4 = scalar_lea.hbm %s1023_s0, %s458_s29  ;;  %s161_s18 = scalar_lea.vmem [#allocation2], %s446_s27 }
  0x35   : > { %s169_s5 = sshll.u32 %s161_s18, 4  ;;  %p910_p13 = pnand %p566_p12, %p883_p6  ;;  %s906_s5 = int_to_ptr.vmem [resolvable:$true] %s169_s5 }
  0x36   : > { %s914_s15 = scalar_lea.sflag [#allocation3], %s157_s23  ;;  %s650_s16 = scalar_lea.hbm %s904_s4, 256 }
  0x37   : > { %p651_p0 = scmp.ne.s32.totalorder %s904_s4, %s650_s16  ;;  %p652_p3 = pneg %p910_p13 }
  0x38   : > { %s655_s22 = scalar_lea.hbm %s1023_s0, 512  ;;  %p656_p9 = scmp.lt.u32.totalorder %s904_s4, %s1023_s0 }
  0x39   : > { %p653_p5 = pnand %p652_p3, %p651_p0  ;;  %p657_p1 = scmp.lt.u32.totalorder %s655_s22, %s650_s16 }
  0x3a   : > { %p659_p4 = scmp.lt.u32.totalorder %s650_s16, %s904_s4 }
  0x3b   : > { %p654_p7 = pneg %p653_p5  ;;  %p658_p2 = por %p657_p1, %p656_p9 }
  0x3d   : > { %p660_p6 = por %p659_p4, %p658_p2 }
  0x3f   : > { %p661_p8 = pnand %p660_p6, %p654_p7 }
  0x41   : > { %664 = shalt.err (!%p661_p8)
}
  0x42   : > { %s665_s23 = scalar_lea.vmem %s906_s5, 256  ;;  %s771_s3 = smov [#allocation2]  }
  0x43   : > { %p666_p12 = scmp.ne.s32.totalorder %s906_s5, %s665_s23  ;;  %s670_s18 = sshll.u32 %s771_s3, 4  ;;  %s671_s18 = int_to_ptr.vmem [resolvable:$false] %s670_s18 }
  0x44   : > { %s672_s26 = scalar_lea.vmem %s671_s18, 512  ;;  %p673_p5 = scmp.lt.s32.totalorder %s906_s5, %s671_s18 }
  0x45   : > { %p668_p11 = pnand %p666_p12, %p652_p3  ;;  %p674_p9 = scmp.lt.s32.totalorder %s672_s26, %s665_s23 }
  0x47   : > { %p669_p0 = pneg %p668_p11  ;;  %p675_p1 = por %p674_p9, %p673_p5 }
  0x49   : > { %p676_p2 = pnand %p675_p1, %p669_p0 }
  0x4b   : > { %679 = shalt.err (!%p676_p2)
}
  0x4c   : > { %560 = dma.hbm_to_vmem [thread:$0]  (!%p910_p13), %s904_s4, 256, %s906_s5, %s914_s15, %s769_s6, %s769_s6, %s770_s7  }
  0x4d   : > { %p1040_p3 = scmp.ne.s32.totalorder %s1034_s21, 0 }
  0x4e   : > { %s948_s16 = sand.u32 (!%p1040_p3), 1, %s750_s10   ;;  %p1041_p7 = scmp.ne.s32.totalorder (!%p1040_p3), %s1032_s19, 0 }
  0x4f   : > { %181 = sbr.rel (%p1040_p3) target bundleno = 353 (0x161), region = 28  ;;  %s450_s27 = sshll.u32 (!%p1040_p3), %s948_s16, 4 }
  0x50   : > { %s184_s22 = scalar_lea.sflag (!%p1040_p3), [#allocation3], %s948_s16  ;;  %s954_s8 = scalar_lea.vmem (!%p1040_p3), [#allocation2], %s450_s27 }
  0x56   : > { %733 = dma.done.wait (%p1041_p7), %s184_s22, 256  }
  0x57   : > { %735 = vsyncadd (%p1041_p7), %s184_s22, 4294967040  ;;  %p1042_p13 = scmp.ne.s32.totalorder %s1030_s17, 0 }
  0x59   : > { %737 = dma.done.wait (%p1042_p13), [#allocation6], 2048  }
  0x5a   : > { %739 = vsyncadd (%p1042_p13), [#allocation6], 4294965248  ;;  %v217_v0 = vld [vmem:[#allocation5] sm:$0xff]  ;;  %v218_v1 = vld [vmem:[#allocation5 + $0x8] sm:$0xff]  ;;  %s211_s17 = scalar_lea.vmem [#allocation7], %s450_s27  ;;  %s459_s21 = sshll.u32 %s758_s12, 8 }
  0x5b   : > { %v219_v2 = vld [vmem:[#allocation5 + $0x10] sm:$0xff]  ;;  %v513_v3 = vpack.c.bf16 %v218_v1, %v217_v0  ;;  %v220_v4 = vld [vmem:[#allocation5 + $0x18] sm:$0xff]  ;;  %v221_v6 = vld [vmem:[#allocation5 + $0x20] sm:$0xff]  ;;  %s339_s19 = sshll.u32 %s211_s17, 4  ;;  %s974_s4 = scalar_lea.hbm %s1025_s2, %s459_s21  ;;  %s969_s19 = int_to_ptr.vmem [resolvable:$true] %s339_s19 }
  0x5c   : > { %v517_v5 = vpack.c.bf16 %v220_v4, %v219_v2  ;;  %v222_v7 = vld [vmem:[#allocation5 + $0x28] sm:$0xff]  ;;  %v215_v9 = vld [vmem:[%s954_s8] sm:$0xff]  ;;  %v224_v11 = vld [vmem:[#allocation5 + $0x38] sm:$0xff]  ;;  %s325_s5 = scalar_lea.sflag [#allocation4], %s948_s16  ;;  %s680_s15 = scalar_lea.vmem %s969_s19, 256 }
  0x5d   : > { %514 = vmatprep.subr.bf16.mxu0 %v513_v3  ;;  %v521_v8 = vpack.c.bf16 %v222_v7, %v221_v6  ;;  %v223_v10 = vld [vmem:[#allocation5 + $0x30] sm:$0xff]  ;;  %510 = vmatprep.mubr.f32.mxu0 %v215_v9  ;;  %v225_v13 = vld [vmem:[#allocation5 + $0x40] sm:$0xff]  ;;  %v226_v14 = vld [vmem:[#allocation5 + $0x48] sm:$0xff]  ;;  %p681_p4 = scmp.ne.s32.totalorder %s969_s19, %s680_s15  ;;  %s772_s12 = smov [#allocation7]  }
  0x5e   : > { %516 = vmatpush3.bf16.msra.mxu0 %v513_v3  ;;  %v525_v12 = vpack.c.bf16 %v224_v11, %v223_v10  ;;  %v529_v15 = vpack.c.bf16 %v226_v14, %v225_v13  ;;  %v227_v16 = vld [vmem:[#allocation5 + $0x50] sm:$0xff]  ;;  %v228_v17 = vld [vmem:[#allocation5 + $0x58] sm:$0xff]  ;;  %v229_v19 = vld [vmem:[#allocation5 + $0x60] sm:$0xff]  ;;  %s684_s29 = sshll.u32 %s772_s12, 4  ;;  %s685_s29 = int_to_ptr.vmem [resolvable:$false] %s684_s29 }
  0x5f   : > { %518 = vmatprep.subr.bf16.mxu0 %v517_v5  ;;  %v533_v18 = vpack.c.bf16 %v228_v17, %v227_v16  ;;  %v230_v20 = vld [vmem:[#allocation5 + $0x68] sm:$0xff]  ;;  %v231_v22 = vld [vmem:[#allocation5 + $0x70] sm:$0xff]  ;;  %v232_v23 = vld [vmem:[#allocation5 + $0x78] sm:$0xff]  ;;  %p682_p6 = pnand %p681_p4, %p889_p10  ;;  %s686_s30 = scalar_lea.vmem %s685_s29, 512 }
  0x60   : > { %v537_v21 = vpack.c.bf16 %v230_v20, %v229_v19  ;;  %v541_v24 = vpack.c.bf16 %v232_v23, %v231_v22  ;;  %v216_v25 = vld [vmem:[%s954_s8 + $0x8] sm:$0xff]  ;;  %p687_p12 = scmp.lt.s32.totalorder %s969_s19, %s685_s29  ;;  %p688_p11 = scmp.lt.s32.totalorder %s686_s30, %s680_s15 }
  0x61   : > { %p683_p8 = pneg %p682_p6 }
  0x62   : > { %520 = vmatpush3.bf16.msra.mxu0 %v517_v5  ;;  %p689_p0 = por %p688_p11, %p687_p12 }
  0x63   : > { %522 = vmatprep.subr.bf16.mxu0 %v521_v8 }
  0x64   : > { %p690_p5 = pnand %p689_p0, %p683_p8 }
  0x66   : > { %524 = vmatpush3.bf16.msra.mxu0 %v521_v8 }
  0x67   : > { %526 = vmatprep.subr.bf16.mxu0 %v525_v12 }
  0x6a   : > { %528 = vmatpush3.bf16.msra.mxu0 %v525_v12 }
  0x6b   : > { %530 = vmatprep.subr.bf16.mxu0 %v529_v15 }
  0x6e   : > { %532 = vmatpush3.bf16.msra.mxu0 %v529_v15 }
  0x6f   : > { %534 = vmatprep.subr.bf16.mxu0 %v533_v18 }
  0x72   : > { %536 = vmatpush3.bf16.msra.mxu0 %v533_v18 }
  0x73   : > { %538 = vmatprep.subr.bf16.mxu0 %v537_v21 }
  0x76   : > { %540 = vmatpush3.bf16.msra.mxu0 %v537_v21 }
  0x77   : > { %542 = vmatprep.subr.bf16.mxu0 %v541_v24 }
  0x7a   : > { %544 = vmatpush3.bf16.msra.mxu0 %v541_v24 }
  0x7d   : > { %511 = vmatmul.mubr.f32.vlgmr.msra.gmra.mrb[0].mxu0 %v216_v25 }
 0x150   : > { %v512_v26 = vpop.f32.mrb[0].mxu0 }
 0x151   : > { %313 = vst [vmem:[%s211_s17 + $0x8] sm:$0xff] %v512_v26  ;;  %v299_v27 = vpop.f32.mrb[1].mxu0 }
 0x152   : > { %312 = vst [vmem:[%s211_s17] sm:$0xff] %v299_v27 }
 0x153   : > { %693 = shalt.err (!%p690_p5)
}
 0x154   : > { %s694_s23 = scalar_lea.hbm %s974_s4, 256  ;;  %s698_s26 = scalar_lea.hbm %s1025_s2, 512 }
 0x155   : > { %p695_p9 = scmp.ne.s32.totalorder %s974_s4, %s694_s23  ;;  %p699_p3 = scmp.lt.u32.totalorder %s974_s4, %s1025_s2 }
 0x156   : > { %p700_p7 = scmp.lt.u32.totalorder %s698_s26, %s694_s23  ;;  %p702_p4 = scmp.lt.u32.totalorder %s694_s23, %s974_s4 }
 0x157   : > { %p696_p1 = pnand %p695_p9, %p889_p10 }
 0x158   : > { %p701_p13 = por %p700_p7, %p699_p3 }
 0x159   : > { %p697_p2 = pneg %p696_p1 }
 0x15a   : > { %p703_p6 = por %p702_p4, %p701_p13 }
 0x15c   : > { %p704_p8 = pnand %p703_p6, %p697_p2 }
 0x15e   : > { %707 = shalt.err (!%p704_p8)
}
 0x15f   : > { %s773_s8 = smov 128   ;;  %s774_s17 = smov 8  }
 0x160   : > { %551 = dma.vmem_to_hbm [thread:$0]  (%p889_p10), %s969_s19, 256, %s974_s4, %s325_s5, %s773_s8, %s773_s8, %s774_s17  }
 0x161 PF: > { %s354_s21 = sand.u32 1, %s746_s9   ;;  %p1043_p12 = scmp.ne.s32.totalorder %s1033_s20, 0 }
 0x162   : > { %p1044_p11 = scmp.ge.s32.totalorder %s766_s14, 2  ;;  %s355_s6 = scalar_lea.sflag [#allocation4], %s354_s21 }
 0x164   : > { %p562_p0 = pnand %p1044_p11, %p1043_p12 }
 0x166   : > { %741 = dma.done.wait (!%p562_p0), %s355_s6, 256  }
 0x167   : > { %743 = vsyncadd (!%p562_p0), %s355_s6, 4294967040  ;;  %s19_s14 = sadd.s32 1, %s766_s14   ;;  %s1045_s9 = smov %s750_s10 }
 0x168   : > { %p16_p5 = scmp.ge.s32.totalorder %s19_s14, 4   ;;  %s1046_s10 = smov %s754_s11 }
 0x169   : > { %s1047_s11 = smov %s898_s28  ;;  %s1048_s12 = smov %s762_s13 }
 0x16a   : > { %s1049_s13 = smov %s1051_s25  ;;  %18 = sbr.rel (!%p16_p5) target bundleno = 7 (0x7), region = 86 }
 0x171   :  { %360 = vsyncpa [#allocation3], 1 }
 0x172   :  { %362 = vsyncpa [#allocation3 + $0x1], 1 }
 0x173   :  { %363 = vsyncpa [#allocation6], 1 }
 0x174   :  { %364 = vsyncpa [#allocation4], 1 }
 0x175   :  { %366 = vsyncpa [#allocation4 + $0x1], 1 }

</bundles_post_ra>
